<compile_context>
chip_gen: v7x
topology: tpu7x:2x2x1
jax: 0.10.0
libtpu: 0.0.40
codegen_flags: <defaults>
</compile_context>

<pallas_src>
import functools
import math

import jax
import jax.numpy as jnp
from jax import lax
from jax.experimental import pallas as pl
from jax.experimental.pallas import tpu as pltpu
import numpy as np


# ---------------------------------------------------------------------------
# Pallas kernel: one grid step == one batch block, full MHA forward fused.
# ---------------------------------------------------------------------------
def mha_kernel(x_ref,
               wq_ref, bq_ref, wk_ref, bk_ref, wv_ref, bv_ref, wf_ref, bf_ref,
               out_ref, attn_ref, *, n_head, d_k, d_v):
    bblk, T, d_model = x_ref.shape
    inv_temp = 1.0 / math.sqrt(float(d_model))   # ScaledDotProductAttention temp

    # Flatten tokens once (bigger MXU M); single bf16 cast feeds all 3 projections.
    x_bf = x_ref[...].astype(jnp.bfloat16).reshape(bblk * T, d_model)

    def proj(w_ref, b_ref):
        return (jnp.dot(x_bf, w_ref[...], preferred_element_type=jnp.float32)
                + b_ref[...])

    # bf16 casts hoisted out of the per-(b, h) loops (one bulk cast each).
    q_bf = (proj(wq_ref, bq_ref) * inv_temp).astype(jnp.bfloat16)  # fold 1/temp in q
    k_bf = proj(wk_ref, bk_ref).astype(jnp.bfloat16)               # (Bblk*T, H*d_k)
    v_bf = proj(wv_ref, bv_ref).astype(jnp.bfloat16)               # (Bblk*T, H*d_v)

    fc_bias = bf_ref[...]                                          # (1, d_model) f32

    for b in range(bblk):
        rows = slice(b * T, (b + 1) * T)
        p_heads = []
        o_heads = []
        for h in range(n_head):
            cq = slice(h * d_k, (h + 1) * d_k)
            cv = slice(h * d_v, (h + 1) * d_v)
            qh = q_bf[rows, cq]                                    # (T, d_k) bf16
            kh = k_bf[rows, cq]                                    # (T, d_k) bf16
            vh = v_bf[rows, cv]                                    # (T, d_v) bf16

            # scores = q @ k^T via dot_general (contract 1 vs 1, no transpose)
            s = lax.dot_general(qh, kh, (((1,), (1,)), ((), ())),
                                preferred_element_type=jnp.float32)  # (T, T) f32
            s = s - jnp.max(s, axis=-1, keepdims=True)
            e = jnp.exp(s)
            p = e * pl.reciprocal(jnp.sum(e, axis=-1, keepdims=True),
                                  approx=True)                     # softmax, f32
            p_heads.append(p)
            o_heads.append(jnp.dot(p.astype(jnp.bfloat16), vh,
                                   preferred_element_type=jnp.float32))  # (T, d_v)

        # One batched attn store per batch element (not per (h, b)).
        attn_ref[:, b] = jnp.stack(p_heads, axis=0).astype(attn_ref.dtype)

        # Single fused fc matmul over the (T, n_head*d_v) staging slab
        # (K = n_head*d_v) instead of n_head K=d_v matmuls + f32 adds.
        o_cat = jnp.concatenate([o.astype(jnp.bfloat16) for o in o_heads], axis=-1)
        fc = jnp.dot(o_cat, wf_ref[...], preferred_element_type=jnp.float32)
        # dropout(fc(.)) + residual; dropout == identity in eval mode.
        # Residual read straight from x_ref (no live f32 copy of the block).
        out_ref[b] = (fc + fc_bias + x_ref[b]).astype(out_ref.dtype)


PARAM_ORDER = ("wq", "bq", "wk", "bk", "wv", "bv", "wf", "bf")


def _default_block_b(B):
    """>=2 grid steps on v7x (2 TensorCores); single step on v5e/v6e (1 TC)."""
    kind = ""
    try:
        kind = jax.devices()[0].device_kind.lower()
    except Exception:
        pass
    if B >= 2 and ("v7" in kind or "7x" in kind):
        return B // 2 if B % 2 == 0 else 1
    return B


def multi_head_attention(x, params, *, n_head, d_k, d_v, block_b=None,
                         attn_dtype=jnp.bfloat16):
    """x: (B, T, d_model) f32 -> (output (B, T, d_model) f32,
                                   attn (n_head*B, T, T) attn_dtype)."""
    B, T, d_model = x.shape
    if block_b is None:
        block_b = _default_block_b(B)
    assert B % block_b == 0
    x = x.astype(jnp.float32)

    # Weights in bf16 (MXU inputs), biases in f32 (accumulator adds).
    plist = []
    for name in PARAM_ORDER:
        p = params[name]
        plist.append(p.astype(jnp.bfloat16) if name.startswith("w")
                     else p.astype(jnp.float32))

    in_specs = [pl.BlockSpec((block_b, T, d_model), lambda b: (b, 0, 0))]
    for p in plist:
        in_specs.append(pl.BlockSpec(p.shape, (lambda b, n=p.ndim: (0,) * n)))

    # Explicit VMEM budget: double-buffered x/out/attn tiles + resident weights,
    # 2x headroom, clamped to v7x's 64 MiB physical VMEM.
    attn_isize = np.dtype(attn_dtype).itemsize
    tile_bytes = (2 * block_b * T * d_model * 4            # x block (f32)
                  + 2 * block_b * T * d_model * 4          # out block (f32)
                  + 2 * n_head * block_b * T * T * attn_isize)
    w_bytes = 2 * sum(int(p.size) * p.dtype.itemsize for p in plist)
    vmem_limit = int(min(max(2 * (tile_bytes + w_bytes) + (4 << 20), 16 << 20),
                         64 << 20))

    out, attn4 = pl.pallas_call(
        functools.partial(mha_kernel, n_head=n_head, d_k=d_k, d_v=d_v),
        out_shape=(jax.ShapeDtypeStruct((B, T, d_model), jnp.float32),
                   jax.ShapeDtypeStruct((n_head, B, T, T), attn_dtype)),
        grid=(B // block_b,),
        in_specs=in_specs,
        out_specs=(pl.BlockSpec((block_b, T, d_model), lambda b: (b, 0, 0)),
                   pl.BlockSpec((n_head, block_b, T, T), lambda b: (0, b, 0, 0))),
        compiler_params=pltpu.CompilerParams(
            dimension_semantics=("parallel",),
            vmem_limit_bytes=vmem_limit),
    )(x, *plist)

    # torch layout: attn batch index is h * B + b  ->  (n_head, B, T, T) reshape.
    return out, attn4.reshape(n_head * B, T, T)


# ---------------------------------------------------------------------------
# Deterministic synthetic parameters. Linear weights stored transposed (in, out).
# ---------------------------------------------------------------------------
def init_params(key, *, d_model, n_head, d_k, d_v):
    keys = jax.random.split(key, 8)

    def w(k, shape, scale=0.08):
        return jax.random.normal(k, shape, jnp.float32) * scale

    return dict(
        wq=w(keys[0], (d_model, n_head * d_k)), bq=w(keys[1], (1, n_head * d_k)),
        wk=w(keys[2], (d_model, n_head * d_k)), bk=w(keys[3], (1, n_head * d_k)),
        wv=w(keys[4], (d_model, n_head * d_v)), bv=w(keys[5], (1, n_head * d_v)),
        wf=w(keys[6], (n_head * d_v, d_model)), bf=w(keys[7], (1, d_model)),
    )


# ---------------------------------------------------------------------------
# Pure-JAX f32 reference (mirrors the PyTorch forward, eval mode, mask=None)
# ---------------------------------------------------------------------------
def multi_head_attention_ref(x, params, *, n_head, d_k, d_v):
    B, T, D = x.shape
    x = x.astype(jnp.float32)

    def lin(wn, bn):
        return x @ params[wn] + params[bn]

    q = lin("wq", "bq").reshape(B, T, n_head, d_k).transpose(2, 0, 1, 3)
    k = lin("wk", "bk").reshape(B, T, n_head, d_k).transpose(2, 0, 1, 3)
    v = lin("wv", "bv").reshape(B, T, n_head, d_v).transpose(2, 0, 1, 3)
    q = q.reshape(n_head * B, T, d_k)
    k = k.reshape(n_head * B, T, d_k)
    v = v.reshape(n_head * B, T, d_v)

    a = jnp.einsum("ntd,nsd->nts", q, k) / (float(D) ** 0.5)
    a = jax.nn.softmax(a, axis=-1)
    o = jnp.einsum("nts,nsd->ntd", a, v)
    o = o.reshape(n_head, B, T, d_v).transpose(1, 2, 0, 3).reshape(B, T, n_head * d_v)
    out = o @ params["wf"] + params["bf"] + x
    return out, a


if __name__ == "__main__":
    key = jax.random.PRNGKey(0)
    kp, kx = jax.random.split(key)

    n_head, d_model, d_k, d_v = 2, 128, 64, 64     # MelStyleEncoder config
    B, T = 2, 8
    params = init_params(kp, d_model=d_model, n_head=n_head, d_k=d_k, d_v=d_v)
    x = jax.random.normal(kx, (B, T, d_model), jnp.float32)

    out, attn = multi_head_attention(x, params, n_head=n_head, d_k=d_k, d_v=d_v)
    out, attn = jax.block_until_ready((out, attn))
    assert out.shape == (B, T, d_model)
    assert attn.shape == (n_head * B, T, T)

    ref_out, ref_attn = multi_head_attention_ref(x, params,
                                                 n_head=n_head, d_k=d_k, d_v=d_v)
    np.testing.assert_allclose(np.asarray(out), np.asarray(ref_out),
                               rtol=2e-2, atol=2e-2)
    np.testing.assert_allclose(np.asarray(attn.astype(jnp.float32)),
                               np.asarray(ref_attn), rtol=2e-2, atol=2e-2)
    print("KERNEL_OK")
</pallas_src>

<mosaic_0001>
module attributes {stable_mosaic.version = 11 : i64} {
  func.func @mha_kernel(%arg0: i32, %arg1: memref<2x8x128xf32, #tpu.memory_space<vmem>>, %arg2: memref<128x128xbf16, #tpu.memory_space<vmem>>, %arg3: memref<1x128xf32, #tpu.memory_space<vmem>>, %arg4: memref<128x128xbf16, #tpu.memory_space<vmem>>, %arg5: memref<1x128xf32, #tpu.memory_space<vmem>>, %arg6: memref<128x128xbf16, #tpu.memory_space<vmem>>, %arg7: memref<1x128xf32, #tpu.memory_space<vmem>>, %arg8: memref<128x128xbf16, #tpu.memory_space<vmem>>, %arg9: memref<1x128xf32, #tpu.memory_space<vmem>>, %arg10: memref<2x8x128xf32, #tpu.memory_space<vmem>>, %arg11: memref<2x2x8x8xbf16, #tpu.memory_space<vmem>>) attributes {dimension_semantics = [#tpu.dimension_semantics<parallel>], iteration_bounds = array<i64: 1>, scalar_prefetch = 0 : i64, scratch_operands = 0 : i64, tpu.core_type = #tpu.core_type<tc>, window_params = [{transform_indices = @transform_0, window_bounds = array<i64: 2, 8, 128>}, {pipeline_mode = #tpu.pipeline_mode<synchronous>, transform_indices = @transform_1, window_bounds = array<i64: 128, 128>}, {pipeline_mode = #tpu.pipeline_mode<synchronous>, transform_indices = @transform_2, window_bounds = array<i64: 1, 128>}, {pipeline_mode = #tpu.pipeline_mode<synchronous>, transform_indices = @transform_3, window_bounds = array<i64: 128, 128>}, {pipeline_mode = #tpu.pipeline_mode<synchronous>, transform_indices = @transform_4, window_bounds = array<i64: 1, 128>}, {pipeline_mode = #tpu.pipeline_mode<synchronous>, transform_indices = @transform_5, window_bounds = array<i64: 128, 128>}, {pipeline_mode = #tpu.pipeline_mode<synchronous>, transform_indices = @transform_6, window_bounds = array<i64: 1, 128>}, {pipeline_mode = #tpu.pipeline_mode<synchronous>, transform_indices = @transform_7, window_bounds = array<i64: 128, 128>}, {pipeline_mode = #tpu.pipeline_mode<synchronous>, transform_indices = @transform_8, window_bounds = array<i64: 1, 128>}, {transform_indices = @transform_9, window_bounds = array<i64: 2, 8, 128>}, {transform_indices = @transform_10, window_bounds = array<i64: 2, 2, 8, 8>}]} {
    %c0 = arith.constant 0 : index
    %c0_0 = arith.constant 0 : index
    %c0_1 = arith.constant 0 : index
    %0 = vector.load %arg1[%c0, %c0_0, %c0_1] : memref<2x8x128xf32, #tpu.memory_space<vmem>>, vector<2x8x128xf32>
    %1 = arith.truncf %0 : vector<2x8x128xf32> to vector<2x8x128xbf16>
    %2 = vector.shape_cast %1 : vector<2x8x128xbf16> to vector<16x128xbf16>
    %c0_2 = arith.constant 0 : index
    %c0_3 = arith.constant 0 : index
    %3 = vector.load %arg2[%c0_2, %c0_3] : memref<128x128xbf16, #tpu.memory_space<vmem>>, vector<128x128xbf16>
    %cst = arith.constant dense<0.000000e+00> : vector<16x128xf32>
    %4 = tpu.matmul %2, %3, %cst {dimension_numbers = #tpu.dot_dimension_numbers<[1], [0], [0], [1], [0, 0, 1, 1], [], []>} : vector<16x128xbf16>, vector<128x128xbf16>, vector<16x128xf32> -> vector<16x128xf32>
    %c0_4 = arith.constant 0 : index
    %c0_5 = arith.constant 0 : index
    %5 = vector.load %arg3[%c0_4, %c0_5] : memref<1x128xf32, #tpu.memory_space<vmem>>, vector<1x128xf32>
    %6 = vector.broadcast %5 : vector<1x128xf32> to vector<16x128xf32>
    %7 = arith.addf %4, %6 : vector<16x128xf32>
    %cst_6 = arith.constant 0.0883883461 : f32
    %8 = vector.broadcast %cst_6 : f32 to vector<16x128xf32>
    %9 = arith.mulf %7, %8 : vector<16x128xf32>
    %10 = arith.truncf %9 : vector<16x128xf32> to vector<16x128xbf16>
    %c0_7 = arith.constant 0 : index
    %c0_8 = arith.constant 0 : index
    %11 = vector.load %arg4[%c0_7, %c0_8] : memref<128x128xbf16, #tpu.memory_space<vmem>>, vector<128x128xbf16>
    %cst_9 = arith.constant dense<0.000000e+00> : vector<16x128xf32>
    %12 = tpu.matmul %2, %11, %cst_9 {dimension_numbers = #tpu.dot_dimension_numbers<[1], [0], [0], [1], [0, 0, 1, 1], [], []>} : vector<16x128xbf16>, vector<128x128xbf16>, vector<16x128xf32> -> vector<16x128xf32>
    %c0_10 = arith.constant 0 : index
    %c0_11 = arith.constant 0 : index
    %13 = vector.load %arg5[%c0_10, %c0_11] : memref<1x128xf32, #tpu.memory_space<vmem>>, vector<1x128xf32>
    %14 = vector.broadcast %13 : vector<1x128xf32> to vector<16x128xf32>
    %15 = arith.addf %12, %14 : vector<16x128xf32>
    %16 = arith.truncf %15 : vector<16x128xf32> to vector<16x128xbf16>
    %c0_12 = arith.constant 0 : index
    %c0_13 = arith.constant 0 : index
    %17 = vector.load %arg6[%c0_12, %c0_13] : memref<128x128xbf16, #tpu.memory_space<vmem>>, vector<128x128xbf16>
    %cst_14 = arith.constant dense<0.000000e+00> : vector<16x128xf32>
    %18 = tpu.matmul %2, %17, %cst_14 {dimension_numbers = #tpu.dot_dimension_numbers<[1], [0], [0], [1], [0, 0, 1, 1], [], []>} : vector<16x128xbf16>, vector<128x128xbf16>, vector<16x128xf32> -> vector<16x128xf32>
    %c0_15 = arith.constant 0 : index
    %c0_16 = arith.constant 0 : index
    %19 = vector.load %arg7[%c0_15, %c0_16] : memref<1x128xf32, #tpu.memory_space<vmem>>, vector<1x128xf32>
    %20 = vector.broadcast %19 : vector<1x128xf32> to vector<16x128xf32>
    %21 = arith.addf %18, %20 : vector<16x128xf32>
    %22 = arith.truncf %21 : vector<16x128xf32> to vector<16x128xbf16>
    %c0_17 = arith.constant 0 : index
    %c0_18 = arith.constant 0 : index
    %23 = vector.load %arg9[%c0_17, %c0_18] : memref<1x128xf32, #tpu.memory_space<vmem>>, vector<1x128xf32>
    %24 = vector.extract_strided_slice %10 {offsets = [0, 0], sizes = [8, 64], strides = [1, 1]} : vector<16x128xbf16> to vector<8x64xbf16>
    %25 = vector.extract_strided_slice %16 {offsets = [0, 0], sizes = [8, 64], strides = [1, 1]} : vector<16x128xbf16> to vector<8x64xbf16>
    %26 = vector.extract_strided_slice %22 {offsets = [0, 0], sizes = [8, 64], strides = [1, 1]} : vector<16x128xbf16> to vector<8x64xbf16>
    %cst_19 = arith.constant dense<0.000000e+00> : vector<8x8xf32>
    %27 = tpu.matmul %24, %25, %cst_19 {dimension_numbers = #tpu.dot_dimension_numbers<[1], [1], [0], [0], [0, 0, 1, 0], [], []>} : vector<8x64xbf16>, vector<8x64xbf16>, vector<8x8xf32> -> vector<8x8xf32>
    %cst_20 = arith.constant dense<0xFF800000> : vector<8xf32>
    %28 = vector.multi_reduction <maximumf>, %27, %cst_20 [1] : vector<8x8xf32> to vector<8xf32>
    %29 = vector.shape_cast %28 : vector<8xf32> to vector<8x1xf32>
    %30 = vector.broadcast %29 : vector<8x1xf32> to vector<8x8xf32>
    %31 = arith.subf %27, %30 : vector<8x8xf32>
    %32 = math.exp %31 : vector<8x8xf32>
    %cst_21 = arith.constant dense<0.000000e+00> : vector<8xf32>
    %33 = vector.multi_reduction <add>, %32, %cst_21 [1] : vector<8x8xf32> to vector<8xf32>
    %34 = vector.shape_cast %33 : vector<8xf32> to vector<8x1xf32>
    %35 = tpu.reciprocal %34 {approx = true} : vector<8x1xf32> -> vector<8x1xf32>
    %36 = vector.broadcast %35 : vector<8x1xf32> to vector<8x8xf32>
    %37 = arith.mulf %32, %36 : vector<8x8xf32>
    %38 = arith.truncf %37 : vector<8x8xf32> to vector<8x8xbf16>
    %cst_22 = arith.constant dense<0.000000e+00> : vector<8x64xf32>
    %39 = tpu.matmul %38, %26, %cst_22 {dimension_numbers = #tpu.dot_dimension_numbers<[1], [0], [0], [1], [0, 0, 1, 1], [], []>} : vector<8x8xbf16>, vector<8x64xbf16>, vector<8x64xf32> -> vector<8x64xf32>
    %40 = vector.extract_strided_slice %10 {offsets = [0, 64], sizes = [8, 64], strides = [1, 1]} : vector<16x128xbf16> to vector<8x64xbf16>
    %41 = vector.extract_strided_slice %16 {offsets = [0, 64], sizes = [8, 64], strides = [1, 1]} : vector<16x128xbf16> to vector<8x64xbf16>
    %42 = vector.extract_strided_slice %22 {offsets = [0, 64], sizes = [8, 64], strides = [1, 1]} : vector<16x128xbf16> to vector<8x64xbf16>
    %cst_23 = arith.constant dense<0.000000e+00> : vector<8x8xf32>
    %43 = tpu.matmul %40, %41, %cst_23 {dimension_numbers = #tpu.dot_dimension_numbers<[1], [1], [0], [0], [0, 0, 1, 0], [], []>} : vector<8x64xbf16>, vector<8x64xbf16>, vector<8x8xf32> -> vector<8x8xf32>
    %cst_24 = arith.constant dense<0xFF800000> : vector<8xf32>
    %44 = vector.multi_reduction <maximumf>, %43, %cst_24 [1] : vector<8x8xf32> to vector<8xf32>
    %45 = vector.shape_cast %44 : vector<8xf32> to vector<8x1xf32>
    %46 = vector.broadcast %45 : vector<8x1xf32> to vector<8x8xf32>
    %47 = arith.subf %43, %46 : vector<8x8xf32>
    %48 = math.exp %47 : vector<8x8xf32>
    %cst_25 = arith.constant dense<0.000000e+00> : vector<8xf32>
    %49 = vector.multi_reduction <add>, %48, %cst_25 [1] : vector<8x8xf32> to vector<8xf32>
    %50 = vector.shape_cast %49 : vector<8xf32> to vector<8x1xf32>
    %51 = tpu.reciprocal %50 {approx = true} : vector<8x1xf32> -> vector<8x1xf32>
    %52 = vector.broadcast %51 : vector<8x1xf32> to vector<8x8xf32>
    %53 = arith.mulf %48, %52 : vector<8x8xf32>
    %54 = arith.truncf %53 : vector<8x8xf32> to vector<8x8xbf16>
    %cst_26 = arith.constant dense<0.000000e+00> : vector<8x64xf32>
    %55 = tpu.matmul %54, %42, %cst_26 {dimension_numbers = #tpu.dot_dimension_numbers<[1], [0], [0], [1], [0, 0, 1, 1], [], []>} : vector<8x8xbf16>, vector<8x64xbf16>, vector<8x64xf32> -> vector<8x64xf32>
    %56 = vector.shape_cast %37 : vector<8x8xf32> to vector<1x8x8xf32>
    %57 = vector.shape_cast %53 : vector<8x8xf32> to vector<1x8x8xf32>
    %58 = tpu.concatenate %56, %57 in 0 : vector<1x8x8xf32>, vector<1x8x8xf32> -> vector<2x8x8xf32>
    %59 = arith.truncf %58 : vector<2x8x8xf32> to vector<2x8x8xbf16>
    %c0_27 = arith.constant 0 : index
    %c0_28 = arith.constant 0 : index
    %c0_29 = arith.constant 0 : index
    %c0_30 = arith.constant 0 : index
    %60 = vector.load %arg11[%c0_27, %c0_28, %c0_29, %c0_30] : memref<2x2x8x8xbf16, #tpu.memory_space<vmem>>, vector<2x1x8x8xbf16>
    %61 = vector.shape_cast %60 : vector<2x1x8x8xbf16> to vector<2x8x8xbf16>
    %62 = vector.shape_cast %59 : vector<2x8x8xbf16> to vector<2x1x8x8xbf16>
    tpu.vector_store %arg11[%c0_27, %c0_28, %c0_29, %c0_30], %62 {strides = array<i32>} : memref<2x2x8x8xbf16, #tpu.memory_space<vmem>>, vector<2x1x8x8xbf16>,
    %63 = arith.truncf %39 : vector<8x64xf32> to vector<8x64xbf16>
    %64 = arith.truncf %55 : vector<8x64xf32> to vector<8x64xbf16>
    %65 = tpu.concatenate %63, %64 in 1 : vector<8x64xbf16>, vector<8x64xbf16> -> vector<8x128xbf16>
    %c0_31 = arith.constant 0 : index
    %c0_32 = arith.constant 0 : index
    %66 = vector.load %arg8[%c0_31, %c0_32] : memref<128x128xbf16, #tpu.memory_space<vmem>>, vector<128x128xbf16>
    %cst_33 = arith.constant dense<0.000000e+00> : vector<8x128xf32>
    %67 = tpu.matmul %65, %66, %cst_33 {dimension_numbers = #tpu.dot_dimension_numbers<[1], [0], [0], [1], [0, 0, 1, 1], [], []>} : vector<8x128xbf16>, vector<128x128xbf16>, vector<8x128xf32> -> vector<8x128xf32>
    %68 = vector.broadcast %23 : vector<1x128xf32> to vector<8x128xf32>
    %69 = arith.addf %67, %68 : vector<8x128xf32>
    %c0_34 = arith.constant 0 : index
    %c0_35 = arith.constant 0 : index
    %c0_36 = arith.constant 0 : index
    %70 = vector.load %arg1[%c0_34, %c0_35, %c0_36] : memref<2x8x128xf32, #tpu.memory_space<vmem>>, vector<1x8x128xf32>
    %71 = vector.shape_cast %70 : vector<1x8x128xf32> to vector<8x128xf32>
    %72 = arith.addf %69, %71 : vector<8x128xf32>
    %c0_37 = arith.constant 0 : index
    %c0_38 = arith.constant 0 : index
    %c0_39 = arith.constant 0 : index
    %73 = vector.load %arg10[%c0_37, %c0_38, %c0_39] : memref<2x8x128xf32, #tpu.memory_space<vmem>>, vector<1x8x128xf32>
    %74 = vector.shape_cast %73 : vector<1x8x128xf32> to vector<8x128xf32>
    %75 = vector.shape_cast %72 : vector<8x128xf32> to vector<1x8x128xf32>
    tpu.vector_store %arg10[%c0_37, %c0_38, %c0_39], %75 {strides = array<i32>} : memref<2x8x128xf32, #tpu.memory_space<vmem>>, vector<1x8x128xf32>,
    %76 = vector.extract_strided_slice %10 {offsets = [8, 0], sizes = [8, 64], strides = [1, 1]} : vector<16x128xbf16> to vector<8x64xbf16>
    %77 = vector.extract_strided_slice %16 {offsets = [8, 0], sizes = [8, 64], strides = [1, 1]} : vector<16x128xbf16> to vector<8x64xbf16>
    %78 = vector.extract_strided_slice %22 {offsets = [8, 0], sizes = [8, 64], strides = [1, 1]} : vector<16x128xbf16> to vector<8x64xbf16>
    %cst_40 = arith.constant dense<0.000000e+00> : vector<8x8xf32>
    %79 = tpu.matmul %76, %77, %cst_40 {dimension_numbers = #tpu.dot_dimension_numbers<[1], [1], [0], [0], [0, 0, 1, 0], [], []>} : vector<8x64xbf16>, vector<8x64xbf16>, vector<8x8xf32> -> vector<8x8xf32>
    %cst_41 = arith.constant dense<0xFF800000> : vector<8xf32>
    %80 = vector.multi_reduction <maximumf>, %79, %cst_41 [1] : vector<8x8xf32> to vector<8xf32>
    %81 = vector.shape_cast %80 : vector<8xf32> to vector<8x1xf32>
    %82 = vector.broadcast %81 : vector<8x1xf32> to vector<8x8xf32>
    %83 = arith.subf %79, %82 : vector<8x8xf32>
    %84 = math.exp %83 : vector<8x8xf32>
    %cst_42 = arith.constant dense<0.000000e+00> : vector<8xf32>
    %85 = vector.multi_reduction <add>, %84, %cst_42 [1] : vector<8x8xf32> to vector<8xf32>
    %86 = vector.shape_cast %85 : vector<8xf32> to vector<8x1xf32>
    %87 = tpu.reciprocal %86 {approx = true} : vector<8x1xf32> -> vector<8x1xf32>
    %88 = vector.broadcast %87 : vector<8x1xf32> to vector<8x8xf32>
    %89 = arith.mulf %84, %88 : vector<8x8xf32>
    %90 = arith.truncf %89 : vector<8x8xf32> to vector<8x8xbf16>
    %cst_43 = arith.constant dense<0.000000e+00> : vector<8x64xf32>
    %91 = tpu.matmul %90, %78, %cst_43 {dimension_numbers = #tpu.dot_dimension_numbers<[1], [0], [0], [1], [0, 0, 1, 1], [], []>} : vector<8x8xbf16>, vector<8x64xbf16>, vector<8x64xf32> -> vector<8x64xf32>
    %92 = vector.extract_strided_slice %10 {offsets = [8, 64], sizes = [8, 64], strides = [1, 1]} : vector<16x128xbf16> to vector<8x64xbf16>
    %93 = vector.extract_strided_slice %16 {offsets = [8, 64], sizes = [8, 64], strides = [1, 1]} : vector<16x128xbf16> to vector<8x64xbf16>
    %94 = vector.extract_strided_slice %22 {offsets = [8, 64], sizes = [8, 64], strides = [1, 1]} : vector<16x128xbf16> to vector<8x64xbf16>
    %cst_44 = arith.constant dense<0.000000e+00> : vector<8x8xf32>
    %95 = tpu.matmul %92, %93, %cst_44 {dimension_numbers = #tpu.dot_dimension_numbers<[1], [1], [0], [0], [0, 0, 1, 0], [], []>} : vector<8x64xbf16>, vector<8x64xbf16>, vector<8x8xf32> -> vector<8x8xf32>
    %cst_45 = arith.constant dense<0xFF800000> : vector<8xf32>
    %96 = vector.multi_reduction <maximumf>, %95, %cst_45 [1] : vector<8x8xf32> to vector<8xf32>
    %97 = vector.shape_cast %96 : vector<8xf32> to vector<8x1xf32>
    %98 = vector.broadcast %97 : vector<8x1xf32> to vector<8x8xf32>
    %99 = arith.subf %95, %98 : vector<8x8xf32>
    %100 = math.exp %99 : vector<8x8xf32>
    %cst_46 = arith.constant dense<0.000000e+00> : vector<8xf32>
    %101 = vector.multi_reduction <add>, %100, %cst_46 [1] : vector<8x8xf32> to vector<8xf32>
    %102 = vector.shape_cast %101 : vector<8xf32> to vector<8x1xf32>
    %103 = tpu.reciprocal %102 {approx = true} : vector<8x1xf32> -> vector<8x1xf32>
    %104 = vector.broadcast %103 : vector<8x1xf32> to vector<8x8xf32>
    %105 = arith.mulf %100, %104 : vector<8x8xf32>
    %106 = arith.truncf %105 : vector<8x8xf32> to vector<8x8xbf16>
    %cst_47 = arith.constant dense<0.000000e+00> : vector<8x64xf32>
    %107 = tpu.matmul %106, %94, %cst_47 {dimension_numbers = #tpu.dot_dimension_numbers<[1], [0], [0], [1], [0, 0, 1, 1], [], []>} : vector<8x8xbf16>, vector<8x64xbf16>, vector<8x64xf32> -> vector<8x64xf32>
    %108 = vector.shape_cast %89 : vector<8x8xf32> to vector<1x8x8xf32>
    %109 = vector.shape_cast %105 : vector<8x8xf32> to vector<1x8x8xf32>
    %110 = tpu.concatenate %108, %109 in 0 : vector<1x8x8xf32>, vector<1x8x8xf32> -> vector<2x8x8xf32>
    %111 = arith.truncf %110 : vector<2x8x8xf32> to vector<2x8x8xbf16>
    %c0_48 = arith.constant 0 : index
    %c1 = arith.constant 1 : index
    %c0_49 = arith.constant 0 : index
    %c0_50 = arith.constant 0 : index
    %112 = vector.load %arg11[%c0_48, %c1, %c0_49, %c0_50] : memref<2x2x8x8xbf16, #tpu.memory_space<vmem>>, vector<2x1x8x8xbf16>
    %113 = vector.shape_cast %112 : vector<2x1x8x8xbf16> to vector<2x8x8xbf16>
    %114 = vector.shape_cast %111 : vector<2x8x8xbf16> to vector<2x1x8x8xbf16>
    tpu.vector_store %arg11[%c0_48, %c1, %c0_49, %c0_50], %114 {strides = array<i32>} : memref<2x2x8x8xbf16, #tpu.memory_space<vmem>>, vector<2x1x8x8xbf16>,
    %115 = arith.truncf %91 : vector<8x64xf32> to vector<8x64xbf16>
    %116 = arith.truncf %107 : vector<8x64xf32> to vector<8x64xbf16>
    %117 = tpu.concatenate %115, %116 in 1 : vector<8x64xbf16>, vector<8x64xbf16> -> vector<8x128xbf16>
    %c0_51 = arith.constant 0 : index
    %c0_52 = arith.constant 0 : index
    %118 = vector.load %arg8[%c0_51, %c0_52] : memref<128x128xbf16, #tpu.memory_space<vmem>>, vector<128x128xbf16>
    %cst_53 = arith.constant dense<0.000000e+00> : vector<8x128xf32>
    %119 = tpu.matmul %117, %118, %cst_53 {dimension_numbers = #tpu.dot_dimension_numbers<[1], [0], [0], [1], [0, 0, 1, 1], [], []>} : vector<8x128xbf16>, vector<128x128xbf16>, vector<8x128xf32> -> vector<8x128xf32>
    %120 = vector.broadcast %23 : vector<1x128xf32> to vector<8x128xf32>
    %121 = arith.addf %119, %120 : vector<8x128xf32>
    %c1_54 = arith.constant 1 : index
    %c0_55 = arith.constant 0 : index
    %c0_56 = arith.constant 0 : index
    %122 = vector.load %arg1[%c1_54, %c0_55, %c0_56] : memref<2x8x128xf32, #tpu.memory_space<vmem>>, vector<1x8x128xf32>
    %123 = vector.shape_cast %122 : vector<1x8x128xf32> to vector<8x128xf32>
    %124 = arith.addf %121, %123 : vector<8x128xf32>
    %c1_57 = arith.constant 1 : index
    %c0_58 = arith.constant 0 : index
    %c0_59 = arith.constant 0 : index
    %125 = vector.load %arg10[%c1_57, %c0_58, %c0_59] : memref<2x8x128xf32, #tpu.memory_space<vmem>>, vector<1x8x128xf32>
    %126 = vector.shape_cast %125 : vector<1x8x128xf32> to vector<8x128xf32>
    %127 = vector.shape_cast %124 : vector<8x128xf32> to vector<1x8x128xf32>
    tpu.vector_store %arg10[%c1_57, %c0_58, %c0_59], %127 {strides = array<i32>} : memref<2x8x128xf32, #tpu.memory_space<vmem>>, vector<1x8x128xf32>,
    return
  }
  func.func @transform_0(%arg0: i32) -> (i32, i32, i32) {
    %c0_i32 = arith.constant 0 : i32
    %c0_i32_0 = arith.constant 0 : i32
    %c0_i32_1 = arith.constant 0 : i32
    return %arg0, %c0_i32, %c0_i32_0 : i32, i32, i32
  }
  func.func @transform_1(%arg0: i32) -> (i32, i32) {
    %c0_i32 = arith.constant 0 : i32
    %c0_i32_0 = arith.constant 0 : i32
    %c0_i32_1 = arith.constant 0 : i32
    return %c0_i32, %c0_i32_0 : i32, i32
  }
  func.func @transform_2(%arg0: i32) -> (i32, i32) {
    %c0_i32 = arith.constant 0 : i32
    %c0_i32_0 = arith.constant 0 : i32
    %c0_i32_1 = arith.constant 0 : i32
    return %c0_i32, %c0_i32_0 : i32, i32
  }
  func.func @transform_3(%arg0: i32) -> (i32, i32) {
    %c0_i32 = arith.constant 0 : i32
    %c0_i32_0 = arith.constant 0 : i32
    %c0_i32_1 = arith.constant 0 : i32
    return %c0_i32, %c0_i32_0 : i32, i32
  }
  func.func @transform_4(%arg0: i32) -> (i32, i32) {
    %c0_i32 = arith.constant 0 : i32
    %c0_i32_0 = arith.constant 0 : i32
    %c0_i32_1 = arith.constant 0 : i32
    return %c0_i32, %c0_i32_0 : i32, i32
  }
  func.func @transform_5(%arg0: i32) -> (i32, i32) {
    %c0_i32 = arith.constant 0 : i32
    %c0_i32_0 = arith.constant 0 : i32
    %c0_i32_1 = arith.constant 0 : i32
    return %c0_i32, %c0_i32_0 : i32, i32
  }
  func.func @transform_6(%arg0: i32) -> (i32, i32) {
    %c0_i32 = arith.constant 0 : i32
    %c0_i32_0 = arith.constant 0 : i32
    %c0_i32_1 = arith.constant 0 : i32
    return %c0_i32, %c0_i32_0 : i32, i32
  }
  func.func @transform_7(%arg0: i32) -> (i32, i32) {
    %c0_i32 = arith.constant 0 : i32
    %c0_i32_0 = arith.constant 0 : i32
    %c0_i32_1 = arith.constant 0 : i32
    return %c0_i32, %c0_i32_0 : i32, i32
  }
  func.func @transform_8(%arg0: i32) -> (i32, i32) {
    %c0_i32 = arith.constant 0 : i32
    %c0_i32_0 = arith.constant 0 : i32
    %c0_i32_1 = arith.constant 0 : i32
    return %c0_i32, %c0_i32_0 : i32, i32
  }
  func.func @transform_9(%arg0: i32) -> (i32, i32, i32) {
    %c0_i32 = arith.constant 0 : i32
    %c0_i32_0 = arith.constant 0 : i32
    %c0_i32_1 = arith.constant 0 : i32
    return %arg0, %c0_i32, %c0_i32_0 : i32, i32, i32
  }
  func.func @transform_10(%arg0: i32) -> (i32, i32, i32, i32) {
    %c0_i32 = arith.constant 0 : i32
    %c0_i32_0 = arith.constant 0 : i32
    %c0_i32_1 = arith.constant 0 : i32
    %c0_i32_2 = arith.constant 0 : i32
    return %c0_i32, %arg0, %c0_i32_0, %c0_i32_1 : i32, i32, i32, i32
  }
}

</mosaic_0001>

<bundles_post_ra>
// kernel: tpu_custom_call.1
= control target key start
LH: loop header
LB: loop body
LE: loop exit
PB: predicated region body
PF: predicated region fallthrough
CT: control target
= control target key end

     0   :  { %16 = vsyncpa [#allocation3], 0  ;;  %s2003_s0 = inlined_call_operand.hbm [shape: f32[2,8,128], index: 0, kind: input, shape index: {}]   ;;  %s2004_s1 = inlined_call_operand.hbm [shape: bf16[128,128], index: 1, kind: input, shape index: {}]   ;;  %s2005_s2 = inlined_call_operand.vmem [shape: f32[1,128], index: 2, kind: input, shape index: {}]   ;;  %s2006_s3 = inlined_call_operand.hbm [shape: bf16[128,128], index: 3, kind: input, shape index: {}]   ;;  %s2007_s4 = inlined_call_operand.vmem [shape: f32[1,128], index: 4, kind: input, shape index: {}]   ;;  %s2008_s5 = inlined_call_operand.hbm [shape: bf16[128,128], index: 5, kind: input, shape index: {}]   ;;  %s2009_s6 = inlined_call_operand.vmem [shape: f32[1,128], index: 6, kind: input, shape index: {}]   ;;  %s2010_s7 = inlined_call_operand.hbm [shape: bf16[128,128], index: 7, kind: input, shape index: {}]   ;;  %s2011_s8 = inlined_call_operand.vmem [shape: f32[1,128], index: 8, kind: input, shape index: {}]   ;;  %s2012_s9 = inlined_call_operand.hbm [shape: f32[2,8,128], index: 9, kind: output, shape index: {0}]   ;;  %s2013_s10 = inlined_call_operand.hbm [shape: bf16[2,2,8,8], index: 10, kind: output, shape index: {1}]  }
   0x1   :  { %17 = vsyncpa [#allocation6], 0 }
   0x2   :  { %18 = vsyncpa [#allocation9], 0 }
   0x3   :  { %19 = vsyncpa [#allocation4], 0 }
   0x4   :  { %20 = vsyncpa [#allocation13], 0  ;;  %s1671_s13 = smov [#allocation5]   ;;  %s1507_s17 = scalar_lea.hbm %s2004_s1, 1024 }
   0x5   :  { %s38_s14 = sshll.u32 %s1671_s13, 4  ;;  %p1508_p0 = scmp.ne.s32.totalorder %s2004_s1, %s1507_s17  ;;  %s39_s14 = int_to_ptr.vmem [resolvable:$true] %s38_s14 }
   0x6   :  { %p1511_p1 = scmp.lt.u32.totalorder %s1507_s17, %s2004_s1 }
   0x8   :  { %p1513_p2 = pnand %p1511_p1, %p1508_p0 }
   0xa   :  { %1516 = shalt.err (!%p1513_p2)
}
   0xb   :  { %s1517_s22 = scalar_lea.vmem %s39_s14, 1024  ;;  %p1522_p4 = scmp.lt.s32.totalorder %s39_s14, %s39_s14 }
   0xc   :  { %p1518_p3 = scmp.ne.s32.totalorder %s39_s14, %s1517_s22  ;;  %p1523_p5 = scmp.lt.s32.totalorder %s1517_s22, %s1517_s22 }
   0xe   :  { %p1524_p6 = por %p1523_p5, %p1522_p4 }
  0x10   :  { %p1525_p7 = pnand %p1524_p6, %p1518_p3 }
  0x12   :  { %1528 = shalt.err (!%p1525_p7)
}
  0x13   :  { %s1672_s23 = smov 64   ;;  %s1673_s24 = smov 4  }
  0x14   :  { %44 = dma.hbm_to_vmem [thread:$0]  %s2004_s1, 1024, %s39_s14, [#allocation6], %s1672_s23, %s1672_s23, %s1673_s24  }
  0x15   :  { %s1674_s27 = smov [#allocation8]   ;;  %s1675_s29 = smov [#allocation2]  }
  0x16   :  { %s66_s28 = sshll.u32 %s1674_s27, 4  ;;  %s26_s30 = sshll.u32 %s1675_s29, 4  ;;  %s67_s28 = int_to_ptr.vmem [resolvable:$true] %s66_s28  ;;  %s27_s30 = int_to_ptr.vmem [resolvable:$true] %s26_s30 }
  0x17   :  { %s1529_s13 = scalar_lea.hbm %s2008_s5, 1024 }
  0x18   :  { %p1530_p8 = scmp.ne.s32.totalorder %s2008_s5, %s1529_s13  ;;  %p1533_p9 = scmp.lt.u32.totalorder %s1529_s13, %s2008_s5 }
  0x1a   :  { %p1535_p10 = pnand %p1533_p9, %p1530_p8 }
  0x1c   :  { %1538 = shalt.err (!%p1535_p10)
}
  0x1d   :  { %s1539_s1 = scalar_lea.vmem %s67_s28, 1024  ;;  %p1544_p12 = scmp.lt.s32.totalorder %s67_s28, %s67_s28 }
  0x1e   :  { %p1540_p11 = scmp.ne.s32.totalorder %s67_s28, %s1539_s1  ;;  %p1545_p13 = scmp.lt.s32.totalorder %s1539_s1, %s1539_s1 }
  0x20   :  { %p1546_p0 = por %p1545_p13, %p1544_p12 }
  0x22   :  { %p1547_p1 = pnand %p1546_p0, %p1540_p11 }
  0x24   :  { %1550 = shalt.err (!%p1547_p1)
}
  0x25   :  { %72 = dma.hbm_to_vmem [thread:$0]  %s2008_s5, 1024, %s67_s28, [#allocation9], %s1672_s23, %s1672_s23, %s1673_s24  }
  0x26   :  { %s1551_s22 = scalar_lea.hbm %s2003_s0, 256 }
  0x27   :  { %p1552_p2 = scmp.ne.s32.totalorder %s2003_s0, %s1551_s22  ;;  %p1555_p3 = scmp.lt.u32.totalorder %s1551_s22, %s2003_s0 }
  0x29   :  { %p1557_p4 = pnand %p1555_p3, %p1552_p2 }
  0x2b   :  { %1560 = shalt.err (!%p1557_p4)
}
  0x2c   :  { %s1561_s11 = scalar_lea.vmem %s27_s30, 256  ;;  %p1566_p6 = scmp.lt.s32.totalorder %s27_s30, %s27_s30 }
  0x2d   :  { %p1562_p5 = scmp.ne.s32.totalorder %s27_s30, %s1561_s11  ;;  %p1567_p7 = scmp.lt.s32.totalorder %s1561_s11, %s1561_s11 }
  0x2f   :  { %p1568_p8 = por %p1567_p7, %p1566_p6 }
  0x31   :  { %p1569_p9 = pnand %p1568_p8, %p1562_p5 }
  0x33   :  { %1572 = shalt.err (!%p1569_p9)
}
  0x34   :  { %s1676_s5 = smov 128   ;;  %s1677_s28 = smov 8  }
  0x35   :  { %32 = dma.hbm_to_vmem [thread:$0]  %s2003_s0, 256, %s27_s30, [#allocation3], %s1676_s5, %s1676_s5, %s1677_s28  }
  0x36   :  { %s1678_s15 = smov [#allocation7]   ;;  %s1679_s17 = smov [#allocation10]  }
  0x37   :  { %s52_s16 = sshll.u32 %s1678_s15, 4  ;;  %s80_s18 = sshll.u32 %s1679_s17, 4  ;;  %s53_s16 = int_to_ptr.vmem [resolvable:$true] %s52_s16  ;;  %s81_s18 = int_to_ptr.vmem [resolvable:$true] %s80_s18 }
  0x38   :  { %s1573_s19 = scalar_lea.hbm %s2006_s3, 1024 }
  0x39   :  { %p1574_p10 = scmp.ne.s32.totalorder %s2006_s3, %s1573_s19  ;;  %p1577_p11 = scmp.lt.u32.totalorder %s1573_s19, %s2006_s3 }
  0x3b   :  { %p1579_p12 = pnand %p1577_p11, %p1574_p10 }
  0x3d   :  { %1582 = shalt.err (!%p1579_p12)
}
  0x3e   :  { %s1583_s0 = scalar_lea.vmem %s53_s16, 1024  ;;  %p1588_p0 = scmp.lt.s32.totalorder %s53_s16, %s53_s16 }
  0x3f   :  { %p1584_p13 = scmp.ne.s32.totalorder %s53_s16, %s1583_s0  ;;  %p1589_p1 = scmp.lt.s32.totalorder %s1583_s0, %s1583_s0 }
  0x41   :  { %p1590_p2 = por %p1589_p1, %p1588_p0 }
  0x43   :  { %p1591_p3 = pnand %p1590_p2, %p1584_p13 }
  0x45   :  { %1594 = shalt.err (!%p1591_p3)
}
  0x46   :  { %58 = dma.hbm_to_vmem [thread:$0]  %s2006_s3, 1024, %s53_s16, [#allocation6], %s1672_s23, %s1672_s23, %s1673_s24  }
  0x47   :  { %s1595_s11 = scalar_lea.hbm %s2010_s7, 1024 }
  0x48   :  { %p1596_p4 = scmp.ne.s32.totalorder %s2010_s7, %s1595_s11  ;;  %p1599_p5 = scmp.lt.u32.totalorder %s1595_s11, %s2010_s7 }
  0x4a   :  { %p1601_p6 = pnand %p1599_p5, %p1596_p4 }
  0x4c   :  { %1604 = shalt.err (!%p1601_p6)
}
  0x4d   :  { %s1605_s1 = scalar_lea.vmem %s81_s18, 1024  ;;  %p1610_p8 = scmp.lt.s32.totalorder %s81_s18, %s81_s18 }
  0x4e   :  { %p1606_p7 = scmp.ne.s32.totalorder %s81_s18, %s1605_s1  ;;  %p1611_p9 = scmp.lt.s32.totalorder %s1605_s1, %s1605_s1 }
  0x50   :  { %p1612_p10 = por %p1611_p9, %p1610_p8 }
  0x52   :  { %p1613_p11 = pnand %p1612_p10, %p1606_p7 }
  0x54   :  { %1616 = shalt.err (!%p1613_p11)
}
  0x55   :  { %86 = dma.hbm_to_vmem [thread:$0]  %s2010_s7, 1024, %s81_s18, [#allocation9], %s1672_s23, %s1672_s23, %s1673_s24  }
  0x56   :  { %1661 = dma.done.wait [#allocation3], 256  }
  0x57   :  { %1662 = vsyncadd [#allocation3], 4294967040 }
  0x58   :  { %1663 = dma.done.wait [#allocation6], 2048  }
  0x59   :  { %1664 = vsyncadd [#allocation6], 4294965248 }
  0x5a   :  { %1665 = dma.done.wait [#allocation9], 2048  }
  0x5b   :  { %1666 = vsyncadd [#allocation9], 4294965248  ;;  %v1680_v0 = vmov 0.0   ;;  %vm1681_vm0 = vmmov 0   ;;  %v1451_v1 = vld [vmem:[#allocation7] sm:$0xff]   ;;  %v1453_v3 = vld [vmem:[#allocation7 + $0x8] sm:$0xff]  }
  0x5c   :  { %1310 = vmatprep.subr.bf16.mxu1 %v1680_v0  ;;  %1290 = vmatprep.subr.bf16.mxu0 %v1680_v0  ;;  %v1452_v2 = vld [vmem:[#allocation5] sm:$0xff]   ;;  %v1454_v4 = vld [vmem:[#allocation5 + $0x8] sm:$0xff]   ;;  %v1455_v5 = vld [vmem:[#allocation7 + $0x10] sm:$0xff]   ;;  %vm457_vm1 = vcmask 523264   ;;  %vm504_vm2 = vcmask 64512   ;;  %vm520_vm3 = vcmask 1043456  }
  0x5d   :  { %1326 = vmatprep.mubr.msk.bf16.mxu1 %vm1681_vm0, %v1680_v0  ;;  %1306 = vmatprep.mubr.msk.bf16.mxu0 %vm1681_vm0, %v1680_v0  ;;  %v1456_v6 = vld [vmem:[#allocation5 + $0x10] sm:$0xff]   ;;  %v1457_v7 = vld [vmem:[#allocation7 + $0x18] sm:$0xff]   ;;  %v1459_v9 = vld [vmem:[#allocation7 + $0x20] sm:$0xff]   ;;  %vm677_vm4 = vcmask 60416  }
  0x5e   :  { %1311 = vmatpush3.bf16.msra.mxu1 %v1451_v1  ;;  %1291 = vmatpush3.bf16.msra.mxu0 %v1452_v2  ;;  %v1458_v8 = vld [vmem:[#allocation5 + $0x18] sm:$0xff]   ;;  %v1460_v10 = vld [vmem:[#allocation5 + $0x20] sm:$0xff]   ;;  %v1461_v11 = vld [vmem:[#allocation7 + $0x28] sm:$0xff]  }
  0x5f   :  { %1312 = vmatprep.subr.bf16.mxu1 %v1680_v0  ;;  %1292 = vmatprep.subr.bf16.mxu0 %v1680_v0  ;;  %v1462_v12 = vld [vmem:[#allocation5 + $0x28] sm:$0xff]   ;;  %v1463_v13 = vld [vmem:[#allocation7 + $0x30] sm:$0xff]   ;;  %v1465_v15 = vld [vmem:[#allocation7 + $0x38] sm:$0xff]  }
  0x60   :  { %v1464_v14 = vld [vmem:[#allocation5 + $0x30] sm:$0xff]   ;;  %v1834_v17 = vld [vmem:[#allocation2 + $0x8] sm:$0xff]  ;;  %v1467_v39 = vld [vmem:[#allocation8] sm:$0xff]  }
  0x61   :  { %v1832_v16 = vld [vmem:[#allocation2] sm:$0xff]  ;;  %v1466_v18 = vld [vmem:[#allocation5 + $0x38] sm:$0xff]   ;;  %v1468_v40 = vld [vmem:[#allocation8 + $0x8] sm:$0xff]  }
  0x62   :  { %1313 = vmatpush3.bf16.msra.mxu1 %v1453_v3  ;;  %1293 = vmatpush3.bf16.msra.mxu0 %v1454_v4  ;;  %v1228_v19 = vpack.c.bf16 %v1834_v17, %v1832_v16  ;;  %v1175_v20 = vld [vmem:[%s2005_s2] ss:$0 sm:$0xff]  ;;  %v1470_v42 = vld [vmem:[#allocation8 + $0x18] sm:$0xff]   ;;  %v1471_v43 = vld [vmem:[#allocation8 + $0x20] sm:$0xff]  }
  0x63   :  { %1314 = vmatprep.subr.bf16.mxu1 %v1680_v0  ;;  %1294 = vmatprep.subr.bf16.mxu0 %v1680_v0  ;;  %v1185_v21 = vld [vmem:[%s2007_s4] ss:$0 sm:$0xff]  ;;  %v1472_v44 = vld [vmem:[#allocation8 + $0x28] sm:$0xff]   ;;  %v1474_v46 = vld [vmem:[#allocation8 + $0x38] sm:$0xff]  }
  0x64   :  { %v1469_v41 = vld [vmem:[#allocation8 + $0x10] sm:$0xff]  }
  0x65   :  { %v1473_v45 = vld [vmem:[#allocation8 + $0x30] sm:$0xff]  }
  0x66   :  { %1315 = vmatpush3.bf16.msra.mxu1 %v1455_v5  ;;  %1295 = vmatpush3.bf16.msra.mxu0 %v1456_v6  ;;  %v1194_v52 = vld [vmem:[%s2009_s6] ss:$0 sm:$0xff] }
  0x67   :  { %1316 = vmatprep.subr.bf16.mxu1 %v1680_v0  ;;  %1296 = vmatprep.subr.bf16.mxu0 %v1680_v0 }
  0x6a   :  { %1317 = vmatpush3.bf16.msra.mxu1 %v1457_v7  ;;  %1297 = vmatpush3.bf16.msra.mxu0 %v1458_v8 }
  0x6b   :  { %1318 = vmatprep.subr.bf16.mxu1 %v1680_v0  ;;  %1298 = vmatprep.subr.bf16.mxu0 %v1680_v0 }
  0x6e   :  { %1319 = vmatpush3.bf16.msra.mxu1 %v1459_v9  ;;  %1299 = vmatpush3.bf16.msra.mxu0 %v1460_v10 }
  0x6f   :  { %1320 = vmatprep.subr.bf16.mxu1 %v1680_v0  ;;  %1300 = vmatprep.subr.bf16.mxu0 %v1680_v0 }
  0x72   :  { %1321 = vmatpush3.bf16.msra.mxu1 %v1461_v11  ;;  %1301 = vmatpush3.bf16.msra.mxu0 %v1462_v12 }
  0x73   :  { %1322 = vmatprep.subr.bf16.mxu1 %v1680_v0  ;;  %1302 = vmatprep.subr.bf16.mxu0 %v1680_v0 }
  0x76   :  { %1323 = vmatpush3.bf16.msra.mxu1 %v1463_v13  ;;  %1303 = vmatpush3.bf16.msra.mxu0 %v1464_v14 }
  0x77   :  { %1324 = vmatprep.subr.bf16.mxu1 %v1680_v0  ;;  %1304 = vmatprep.subr.bf16.mxu0 %v1680_v0 }
  0x7a   :  { %1325 = vmatpush3.bf16.msra.mxu1 %v1465_v15  ;;  %1305 = vmatpush3.bf16.msra.mxu0 %v1466_v18 }
  0x7b   :  { %1350 = vmatprep.subr.bf16.mxu1 %v1680_v0  ;;  %1330 = vmatprep.subr.bf16.mxu0 %v1680_v0 }
  0x7d   :  { %1327 = vmatmul.mubr.bf16.vlgmr.msra.gmra.mrb[0].mxu1 %v1228_v19  ;;  %1307 = vmatmul.mubr.bf16.vlgmr.msra.gmra.mrb[0].mxu0 %v1228_v19 }
  0x7e   :  { %1352 = vmatprep.mubr.msk.bf16.mxu1 %vm1681_vm0, %v1680_v0  ;;  %1346 = vmatprep.mubr.msk.bf16.mxu0 %vm1681_vm0, %v1680_v0 }
  0x7f   :  { %1331 = vmatpush3.bf16.msra.mxu0 %v1467_v39 }
  0x80   :  { %1332 = vmatprep.subr.bf16.mxu0 %v1680_v0 }
  0x83   :  { %1333 = vmatpush3.bf16.msra.mxu0 %v1468_v40 }
  0x84   :  { %1334 = vmatprep.subr.bf16.mxu0 %v1680_v0 }
  0x87   :  { %1335 = vmatpush3.bf16.msra.mxu0 %v1469_v41 }
  0x88   :  { %1336 = vmatprep.subr.bf16.mxu0 %v1680_v0 }
  0x8b   :  { %1337 = vmatpush3.bf16.msra.mxu0 %v1470_v42 }
  0x8c   :  { %1338 = vmatprep.subr.bf16.mxu0 %v1680_v0 }
  0x8f   :  { %1339 = vmatpush3.bf16.msra.mxu0 %v1471_v43 }
  0x90   :  { %1340 = vmatprep.subr.bf16.mxu0 %v1680_v0 }
  0x93   :  { %1341 = vmatpush3.bf16.msra.mxu0 %v1472_v44 }
  0x94   :  { %1342 = vmatprep.subr.bf16.mxu0 %v1680_v0 }
  0x97   :  { %1343 = vmatpush3.bf16.msra.mxu0 %v1473_v45 }
  0x98   :  { %1344 = vmatprep.subr.bf16.mxu0 %v1680_v0 }
  0x9b   :  { %1345 = vmatpush3.bf16.msra.mxu0 %v1474_v46 }
  0x9c   :  { %1374 = vmatprep.subr.bf16.mxu0 %v1680_v0 }
  0x9e   :  { %1347 = vmatmul.mubr.bf16.vlgmr.msra.gmra.mrb[4].mxu0 %v1228_v19 }
  0x9f   :  { %1390 = vmatprep.mubr.msk.bf16.mxu0 %vm1681_vm0, %v1680_v0 }
 0x150   :  { %v335_v22 = vpop.f32.mrb[0].mxu1  ;;  %v220_v24 = vpop.f32.mrb[0].mxu0 }
 0x151   :  { %v1328_v23 = vpop.f32.mrb[1].mxu1  ;;  %v221_v26 = vadd.f32 %v1175_v20, %v220_v24  ;;  %v1308_v27 = vpop.f32.mrb[1].mxu0  ;;  %v336_v28 = vadd.f32 %v1185_v21, %v335_v22 }
 0x152   :  { %v338_v25 = vpop.f32.mrb[2].mxu1  ;;  %v223_v31 = vpop.f32.mrb[2].mxu0 }
 0x153   :  { %v339_v29 = vadd.f32 %v1185_v21, %v338_v25  ;;  %v1329_v30 = vpop.f32.mrb[3].mxu1  ;;  %v227_v32 = vmul.f32 0.088388346, %v221_v26  ;;  %v224_v33 = vadd.f32 %v1175_v20, %v223_v31  ;;  %v1309_v34 = vpop.f32.mrb[3].mxu0 }
 0x155   :  { %v1852_v35 = vpack.c.bf16 %v339_v29, %v336_v28  ;;  %v228_v36 = vmul.f32 0.088388346, %v224_v33 }
 0x157   :  { %568 = vrot.lane.b32.xlu1 %v1852_v35, %s1672_s23  ;;  %v462_v37 = vsel %vm457_vm1, %v1852_v35, 0  ;;  %v1858_v38 = vpack.c.bf16 %v228_v36, %v227_v32  ;;  %v803_v31 = vrot.slane %v1852_v35, 4 }
 0x158   :  { %1351 = vmatpush3.bf16.xpose.msra.mxu1 %v462_v37 }
 0x159   :  { %1356 = vmatprep.subr.bf16.mxu1 %v1680_v0  ;;  %v808_v33 = vsel %vm457_vm1, %v803_v31, 0  ;;  %v802_v36 = vrot.slane %v1858_v38, 4 }
 0x15b   :  { %565 = vrot.lane.b32.xlu1 %v1858_v38, %s1672_s23 }
 0x15f   :  { %1353 = vmatmul.mubr.msk.bf16.vlgmr.msra.gmra.mrb[4].mxu1 %vm457_vm1, %v1858_v38 }
 0x160   :  { %1358 = vmatprep.mubr.msk.bf16.mxu1 %vm1681_vm0, %v1680_v0 }
 0x171   :  { %v448_v53 = vpop.f32.mrb[4].mxu0 }
 0x172   :  { %v449_v54 = vadd.f32 %v1194_v52, %v448_v53  ;;  %v1348_v55 = vpop.f32.mrb[5].mxu0 }
 0x173   :  { %v451_v56 = vpop.f32.mrb[6].mxu0 }
 0x174   :  { %v452_v57 = vadd.f32 %v1194_v52, %v451_v56  ;;  %v1349_v58 = vpop.f32.mrb[7].mxu0 }
 0x176   :  { %v1881_v59 = vpack.c.bf16 %v452_v57, %v449_v54 }
 0x178   :  { %v522_v2 = vsel %vm520_vm3, %v1881_v59, 0  ;;  %v862_v34 = vrot.slane %v1881_v59, 4 }
 0x179   :  { %1357 = vmatpush3.bf16.msra.mxu1 %v522_v2 }
 0x17a   :  { %1362 = vmatprep.subr.bf16.mxu1 %v1680_v0  ;;  %v867_v35 = vsel %vm520_vm3, %v862_v34, 0 }
 0x1c9   :  { %v569_v6 = vpop.permute.xlu1 %568 }
 0x1ca   :  { %v574_v8 = vsel %vm457_vm1, %v569_v6, 0  ;;  %v1477_v6 = vld [vmem:[#allocation10 + $0x10] sm:$0xff]  }
 0x1cd   :  { %v566_v9 = vpop.permute.xlu1 %565 }
 0x232   :  { %v498_v47 = vpop.f32.mrb[4].mxu1 }
 0x233   :  { %v1354_v48 = vpop.f32.mrb[5].mxu1  ;;  %v505_v49 = vsel %vm504_vm2, %v498_v47, -inf }
 0x234   :  { %506 = vmax.xlane.f32.xlu0 %v505_v49  ;;  %v501_v50 = vpop.f32.mrb[6].mxu1 }
 0x235   :  { %v1355_v51 = vpop.f32.mrb[7].mxu1 }
 0x2c1   :  { %v507_v60 = vpop.xlane.xlu0 %506 }
 0x2c2   :  { %v508_v61 = vsub.f32 %v498_v47, %v507_v60 }
 0x2c4   :  { %v509_v62 = vmul.f32 1.442695, %v508_v61 }
 0x2c6   :  { %1491 = vpow2.f32 %v509_v62 }
 0x2d0   :  { %v1492_v63 = vpop.eup %1491 }
 0x2d1   :  { %v511_v1 = vsel %vm504_vm2, %v1492_v63, 0.0 }
 0x2d2   :  { %512 = vadd.xlane.f32.xlu0 %v511_v1 }
 0x35f   :  { %v513_v3 = vpop.xlane.xlu0 %512 }
 0x360   :  { %1493 = vrcp.f32 %v513_v3 }
 0x36a   :  { %v1494_v4 = vpop.eup %1493 }
 0x36b   :  { %v515_v5 = vmul.f32 %v1494_v4, %v1492_v63  ;;  %v1475_v4 = vld [vmem:[#allocation10] sm:$0xff]  }
 0x36c   :  { %1375 = vmatpush3.bf16.msra.mxu0 %v1475_v4 }
 0x36d   :  { %v516_v7 = vpack.c.bf16 %v515_v5, %v515_v5  ;;  %v1476_v5 = vld [vmem:[#allocation10 + $0x8] sm:$0xff]   ;;  %1376 = vmatprep.subr.bf16.mxu0 %v1680_v0 }
 0x36f   :  { %1359 = vmatmul.mubr.msk.bf16.vlgmr.msra.gmra.mrb[8].mxu1 %vm504_vm2, %v516_v7  ;;  %678 = vst.msk [vmem:[#allocation12] sm:$0xf] %vm677_vm4, %v516_v7  ;;  %v1478_v7 = vld [vmem:[#allocation10 + $0x18] sm:$0xff]  }
 0x370   :  { %1363 = vmatpush3.bf16.xpose.msra.mxu1 %v574_v8  ;;  %1364 = vmatprep.mubr.msk.bf16.mxu1 %vm1681_vm0, %v1680_v0  ;;  %v1479_v8 = vld [vmem:[#allocation10 + $0x20] sm:$0xff]  }
 0x371   :  { %1368 = vmatprep.subr.bf16.mxu1 %v1680_v0  ;;  %1377 = vmatpush3.bf16.msra.mxu0 %v1476_v5 }
 0x372   :  { %1378 = vmatprep.subr.bf16.mxu0 %v1680_v0 }
 0x375   :  { %1379 = vmatpush3.bf16.msra.mxu0 %v1477_v6 }
 0x376   :  { %1380 = vmatprep.subr.bf16.mxu0 %v1680_v0 }
 0x377   :  { %1365 = vmatmul.mubr.msk.bf16.vlgmr.msra.gmra.mrb[12].mxu1 %vm457_vm1, %v566_v9  ;;  %v1480_v9 = vld [vmem:[#allocation10 + $0x28] sm:$0xff]  }
 0x378   :  { %1370 = vmatprep.mubr.msk.bf16.mxu1 %vm1681_vm0, %v1680_v0 }
 0x379   :  { %1381 = vmatpush3.bf16.msra.mxu0 %v1478_v7 }
 0x37a   :  { %1382 = vmatprep.subr.bf16.mxu0 %v1680_v0 }
 0x37d   :  { %1383 = vmatpush3.bf16.msra.mxu0 %v1479_v8 }
 0x37e   :  { %1384 = vmatprep.subr.bf16.mxu0 %v1680_v0 }
 0x381   :  { %1385 = vmatpush3.bf16.msra.mxu0 %v1480_v9 }
 0x382   :  { %1386 = vmatprep.subr.bf16.mxu0 %v1680_v0 }
 0x442   :  { %v1896_v10 = vpop.f32.mrb[8].mxu1 }
 0x443   :  { %v1360_v11 = vpop.f32.mrb[9].mxu1 }
 0x444   :  { %v561_v12 = vpop.f32.mrb[10].mxu1  ;;  %v1481_v11 = vld [vmem:[#allocation10 + $0x30] sm:$0xff]  }
 0x445   :  { %v1361_v13 = vpop.f32.mrb[11].mxu1  ;;  %1387 = vmatpush3.bf16.msra.mxu0 %v1481_v11 }
 0x446   :  { %1388 = vmatprep.subr.bf16.mxu0 %v1680_v0 }
 0x44a   :  { %v610_v14 = vpop.f32.mrb[12].mxu1 }
 0x44b   :  { %v1366_v15 = vpop.f32.mrb[13].mxu1  ;;  %v616_v18 = vsel %vm504_vm2, %v610_v14, -inf }
 0x44c   :  { %617 = vmax.xlane.f32.xlu0 %v616_v18  ;;  %v613_v19 = vpop.f32.mrb[14].mxu1 }
 0x44d   :  { %v1367_v20 = vpop.f32.mrb[15].mxu1 }
 0x462   :  { %629 = vrot.lane.b32.xlu0 %v1881_v59, %s1672_s23 }
 0x4d9   :  { %v618_v21 = vpop.xlane.xlu0 %617 }
 0x4da   :  { %v619_v22 = vsub.f32 %v610_v14, %v618_v21  ;;  %v1482_v21 = vld [vmem:[#allocation10 + $0x38] sm:$0xff]  }
 0x4db   :  { %1389 = vmatpush3.bf16.msra.mxu0 %v1482_v21 }
 0x4dc   :  { %v620_v23 = vmul.f32 1.442695, %v619_v22  ;;  %1418 = vmatprep.subr.bf16.mxu0 %v1680_v0 }
 0x4dd   :  { %v630_v24 = vpop.permute.xlu0 %629 }
 0x4de   :  { %1495 = vpow2.f32 %v620_v23  ;;  %v635_v25 = vsel %vm520_vm3, %v630_v24, 0  ;;  %v680_v24 = vpack.c.bf16 %v1896_v10, %v1896_v10  ;;  %v1485_v10 = vld [vmem:[#allocation10 + $0x10] sm:$0xff]  }
 0x4df   :  { %1369 = vmatpush3.bf16.msra.mxu1 %v635_v25 }
 0x4e0   :  { %1394 = vmatprep.subr.bf16.mxu1 %v1680_v0 }
 0x4e8   :  { %v1496_v26 = vpop.eup %1495 }
 0x4e9   :  { %v622_v27 = vsel %vm504_vm2, %v1496_v26, 0.0 }
 0x4ea   :  { %623 = vadd.xlane.f32.xlu1 %v622_v27 }
 0x577   :  { %v624_v28 = vpop.xlane.xlu1 %623 }
 0x578   :  { %1497 = vrcp.f32 %v624_v28 }
 0x582   :  { %v1498_v29 = vpop.eup %1497 }
 0x583   :  { %v626_v30 = vmul.f32 %v1498_v29, %v1496_v26 }
 0x585   :  { %v627_v32 = vpack.c.bf16 %v626_v30, %v626_v30  ;;  %v1483_v30 = vld [vmem:[#allocation10] sm:$0xff]  }
 0x587   :  { %1371 = vmatmul.mubr.msk.bf16.vlgmr.msra.gmra.mrb[16].mxu1 %vm504_vm2, %v627_v32  ;;  %679 = vst.msk [vmem:[#allocation12 + $0x8] sm:$0xf] %vm677_vm4, %v627_v32  ;;  %v1486_v32 = vld [vmem:[#allocation10 + $0x18] sm:$0xff]  }
 0x588   :  { %1395 = vmatpush3.bf16.xpose.msra.mxu1 %v808_v33  ;;  %1396 = vmatprep.mubr.msk.bf16.mxu1 %vm1681_vm0, %v1680_v0  ;;  %v1487_v33 = vld [vmem:[#allocation10 + $0x20] sm:$0xff]  }
 0x589   :  { %1400 = vmatprep.subr.bf16.mxu1 %v1680_v0 }
 0x58f   :  { %1397 = vmatmul.mubr.msk.bf16.vlgmr.msra.gmra.mrb[20].mxu1 %vm457_vm1, %v802_v36 }
 0x590   :  { %1401 = vmatpush3.bf16.msra.mxu1 %v867_v35  ;;  %1402 = vmatprep.mubr.msk.bf16.mxu1 %vm1681_vm0, %v1680_v0  ;;  %v1490_v35 = vld [vmem:[#allocation10 + $0x38] sm:$0xff]  }
 0x591   :  { %1406 = vmatprep.subr.bf16.mxu1 %v1680_v0 }
 0x65a   :  { %v1918_v37 = vpop.f32.mrb[16].mxu1 }
 0x65b   :  { %v1372_v39 = vpop.f32.mrb[17].mxu1  ;;  %v681_v22 = vpack.c.bf16 %v1918_v37, %v1918_v37  ;;  %v1207_v37 = vld [vmem:[%s2011_s8] ss:$0 sm:$0xff]  ;;  %s1682_s8 = smov [#allocation12]  }
 0x65c   :  { %v674_v40 = vpop.f32.mrb[18].mxu1  ;;  %s1157_s21 = sshll.u32 %s1682_s8, 4  ;;  %s1158_s21 = int_to_ptr.vmem [resolvable:$true] %s1157_s21 }
 0x65d   :  { %v1373_v41 = vpop.f32.mrb[19].mxu1  ;;  %s1617_s22 = scalar_lea.vmem %s1158_s21, 256  ;;  %p1622_p13 = scmp.lt.s32.totalorder %s1158_s21, %s1158_s21 }
 0x65e   :  { %p1618_p12 = scmp.ne.s32.totalorder %s1158_s21, %s1617_s22  ;;  %p1623_p0 = scmp.lt.s32.totalorder %s1617_s22, %s1617_s22 }
 0x660   :  { %p1624_p1 = por %p1623_p0, %p1622_p13 }
 0x662   :  { %v844_v42 = vpop.f32.mrb[20].mxu1  ;;  %p1625_p2 = pnand %p1624_p1, %p1618_p12 }
 0x663   :  { %v1398_v43 = vpop.f32.mrb[21].mxu1  ;;  %v850_v44 = vsel %vm504_vm2, %v844_v42, -inf }
 0x664   :  { %851 = vmax.xlane.f32.xlu0 %v850_v44  ;;  %v847_v38 = vpop.f32.mrb[22].mxu1 }
 0x665   :  { %v1399_v45 = vpop.f32.mrb[23].mxu1 }
 0x67a   :  { %909 = vrot.lane.b32.xlu0 %v802_v36, %s1672_s23  ;;  %v1489_v36 = vld [vmem:[#allocation10 + $0x30] sm:$0xff]  }
 0x6f1   :  { %v852_v46 = vpop.xlane.xlu0 %851 }
 0x6f2   :  { %v853_v47 = vsub.f32 %v844_v42, %v852_v46 }
 0x6f4   :  { %v854_v48 = vmul.f32 1.442695, %v853_v47 }
 0x6f5   :  { %v910_v57 = vpop.permute.xlu0 %909 }
 0x6f6   :  { %1499 = vpow2.f32 %v854_v48 }
 0x700   :  { %v1500_v49 = vpop.eup %1499 }
 0x701   :  { %v856_v50 = vsel %vm504_vm2, %v1500_v49, 0.0 }
 0x702   :  { %857 = vadd.xlane.f32.xlu1 %v856_v50 }
 0x713   :  { %911 = vrot.lane.b32.xlu1 %v803_v31, %s1672_s23  ;;  %v1484_v31 = vld [vmem:[#allocation10 + $0x8] sm:$0xff]  }
 0x78f   :  { %v858_v51 = vpop.xlane.xlu1 %857 }
 0x790   :  { %1501 = vrcp.f32 %v858_v51 }
 0x793   :  { %v912_v54 = vpop.permute.xlu1 %911 }
 0x794   :  { %v917_v56 = vsel %vm457_vm1, %v912_v54, 0 }
 0x79a   :  { %v1502_v52 = vpop.eup %1501 }
 0x79b   :  { %v860_v53 = vmul.f32 %v1502_v52, %v1500_v49 }
 0x79d   :  { %v861_v55 = vpack.c.bf16 %v860_v53, %v860_v53 }
 0x79f   :  { %1403 = vmatmul.mubr.msk.bf16.vlgmr.msra.gmra.mrb[24].mxu1 %vm504_vm2, %v861_v55  ;;  %1020 = vst.msk [vmem:[#allocation12 + $0x4] sm:$0xf] %vm677_vm4, %v861_v55 }
 0x7a0   :  { %1407 = vmatpush3.bf16.xpose.msra.mxu1 %v917_v56  ;;  %1408 = vmatprep.mubr.msk.bf16.mxu1 %vm1681_vm0, %v1680_v0 }
 0x7a1   :  { %1412 = vmatprep.subr.bf16.mxu1 %v1680_v0 }
 0x7a7   :  { %1409 = vmatmul.mubr.msk.bf16.vlgmr.msra.gmra.mrb[28].mxu1 %vm457_vm1, %v910_v57 }
 0x7a8   :  { %1414 = vmatprep.mubr.msk.bf16.mxu1 %vm1681_vm0, %v1680_v0 }
 0x872   :  { %v1933_v58 = vpop.f32.mrb[24].mxu1 }
 0x873   :  { %v1404_v59 = vpop.f32.mrb[25].mxu1  ;;  %v1022_v48 = vpack.c.bf16 %v1933_v58, %v1933_v58 }
 0x874   :  { %v906_v60 = vpop.f32.mrb[26].mxu1 }
 0x875   :  { %v1405_v61 = vpop.f32.mrb[27].mxu1 }
 0x87a   :  { %v953_v62 = vpop.f32.mrb[28].mxu1 }
 0x87b   :  { %v1410_v63 = vpop.f32.mrb[29].mxu1  ;;  %v959_v1 = vsel %vm504_vm2, %v953_v62, -inf }
 0x87c   :  { %960 = vmax.xlane.f32.xlu1 %v959_v1  ;;  %v956_v2 = vpop.f32.mrb[30].mxu1 }
 0x87d   :  { %v1411_v3 = vpop.f32.mrb[31].mxu1 }
 0x88d   :  { %971 = vrot.lane.b32.xlu1 %v862_v34, %s1672_s23  ;;  %v1488_v34 = vld [vmem:[#allocation10 + $0x28] sm:$0xff]  }
 0x909   :  { %v961_v12 = vpop.xlane.xlu1 %960 }
 0x90a   :  { %v962_v13 = vsub.f32 %v953_v62, %v961_v12 }
 0x90c   :  { %v963_v14 = vmul.f32 1.442695, %v962_v13 }
 0x90d   :  { %v972_v15 = vpop.permute.xlu1 %971 }
 0x90e   :  { %1503 = vpow2.f32 %v963_v14  ;;  %v977_v18 = vsel %vm520_vm3, %v972_v15, 0 }
 0x90f   :  { %1413 = vmatpush3.bf16.msra.mxu1 %v977_v18 }
 0x918   :  { %v1504_v19 = vpop.eup %1503 }
 0x919   :  { %v965_v20 = vsel %vm504_vm2, %v1504_v19, 0.0 }
 0x91a   :  { %966 = vadd.xlane.f32.xlu0 %v965_v20 }
 0x930   :  { %683 = vrot.lane.b32.xlu0 %v681_v22, %s1672_s23 }
 0x9a7   :  { %v967_v23 = vpop.xlane.xlu0 %966 }
 0x9a8   :  { %1505 = vrcp.f32 %v967_v23 }
 0x9ab   :  { %v684_v25 = vpop.permute.xlu0 %683 }
 0x9ac   :  { %v687_v26 = vsel %vm457_vm1, %v680_v24, %v684_v25 }
 0x9ad   :  { %1391 = vmatmul.mubr.bf16.vlgmr.msra.gmra.mrb[8].mxu0 %v687_v26 }
 0x9ae   :  { %1434 = vmatprep.mubr.msk.bf16.mxu0 %vm1681_vm0, %v1680_v0  ;;  %1419 = vmatpush3.bf16.msra.mxu0 %v1483_v30 }
 0x9af   :  { %1420 = vmatprep.subr.bf16.mxu0 %v1680_v0 }
 0x9b2   :  { %v1506_v27 = vpop.eup %1505  ;;  %1421 = vmatpush3.bf16.msra.mxu0 %v1484_v31 }
 0x9b3   :  { %v969_v28 = vmul.f32 %v1506_v27, %v1504_v19  ;;  %1422 = vmatprep.subr.bf16.mxu0 %v1680_v0 }
 0x9b5   :  { %v970_v29 = vpack.c.bf16 %v969_v28, %v969_v28 }
 0x9b6   :  { %1423 = vmatpush3.bf16.msra.mxu0 %v1485_v10 }
 0x9b7   :  { %1415 = vmatmul.mubr.msk.bf16.vlgmr.msra.gmra.mrb[32].mxu1 %vm504_vm2, %v970_v29  ;;  %1021 = vst.msk [vmem:[#allocation12 + $0xc] sm:$0xf] %vm677_vm4, %v970_v29  ;;  %1424 = vmatprep.subr.bf16.mxu0 %v1680_v0 }
 0x9ba   :  { %1425 = vmatpush3.bf16.msra.mxu0 %v1486_v32 }
 0x9bb   :  { %1426 = vmatprep.subr.bf16.mxu0 %v1680_v0 }
 0x9be   :  { %1427 = vmatpush3.bf16.msra.mxu0 %v1487_v33 }
 0x9bf   :  { %1428 = vmatprep.subr.bf16.mxu0 %v1680_v0 }
 0x9c2   :  { %1429 = vmatpush3.bf16.msra.mxu0 %v1488_v34 }
 0x9c3   :  { %1430 = vmatprep.subr.bf16.mxu0 %v1680_v0 }
 0x9c6   :  { %1431 = vmatpush3.bf16.msra.mxu0 %v1489_v36 }
 0x9c7   :  { %1432 = vmatprep.subr.bf16.mxu0 %v1680_v0 }
 0x9ca   :  { %1433 = vmatpush3.bf16.msra.mxu0 %v1490_v35 }
 0xa80   :  { %v793_v39 = vpop.f32.mrb[8].mxu0 }
 0xa81   :  { %v794_v40 = vadd.f32 %v1207_v37, %v793_v39  ;;  %v1392_v41 = vpop.f32.mrb[9].mxu0 }
 0xa82   :  { %v796_v42 = vpop.f32.mrb[10].mxu0 }
 0xa83   :  { %v800_v43 = vadd.f32 %v794_v40, %v1832_v16  ;;  %v1393_v44 = vpop.f32.mrb[11].mxu0 }
 0xa85   :  { %801 = vst [vmem:[#allocation11] sm:$0xff] %v800_v43 }
 0xa8a   :  { %v1013_v38 = vpop.f32.mrb[32].mxu1 }
 0xa8b   :  { %v1023_v45 = vpack.c.bf16 %v1013_v38, %v1013_v38  ;;  %v1416_v46 = vpop.f32.mrb[33].mxu1 }
 0xa8c   :  { %v1016_v47 = vpop.f32.mrb[34].mxu1 }
 0xa8d   :  { %1025 = vrot.lane.b32.xlu1 %v1023_v45, %s1672_s23  ;;  %v1417_v0 = vpop.f32.mrb[35].mxu1 }
 0xaff   :  { %v1026_v49 = vpop.permute.xlu1 %1025 }
 0xb00   :  { %v1029_v50 = vsel %vm457_vm1, %v1022_v48, %v1026_v49 }
 0xb01   :  { %1435 = vmatmul.mubr.bf16.vlgmr.msra.gmra.mrb[12].mxu0 %v1029_v50 }
 0xb02   :  { %1628 = shalt.err (!%p1625_p2)
}
 0xb03   :  { %s1629_s30 = scalar_lea.hbm %s2013_s10, 256 }
 0xb04   :  { %p1630_p3 = scmp.ne.s32.totalorder %s2013_s10, %s1629_s30  ;;  %p1633_p4 = scmp.lt.u32.totalorder %s1629_s30, %s2013_s10 }
 0xb06   :  { %p1635_p5 = pnand %p1633_p4, %p1630_p3 }
 0xb08   :  { %1638 = shalt.err (!%p1635_p5)
}
 0xb09   :  { %1163 = dma.vmem_to_hbm [thread:$0]  %s1158_s21, 256, %s2013_s10, [#allocation13], %s1672_s23, %s1672_s23, %s1673_s24  }
 0xb0a   :  { %s1683_s15 = smov [#allocation11]  }
 0xb0b   :  { %s1145_s17 = sshll.u32 %s1683_s15, 4  ;;  %s1146_s17 = int_to_ptr.vmem [resolvable:$true] %s1145_s17 }
 0xb0c   :  { %s1639_s1 = scalar_lea.vmem %s1146_s17, 256  ;;  %p1644_p7 = scmp.lt.s32.totalorder %s1146_s17, %s1146_s17 }
 0xb0d   :  { %p1640_p6 = scmp.ne.s32.totalorder %s1146_s17, %s1639_s1  ;;  %p1645_p8 = scmp.lt.s32.totalorder %s1639_s1, %s1639_s1 }
 0xb0f   :  { %p1646_p9 = por %p1645_p8, %p1644_p7 }
 0xb11   :  { %p1647_p10 = pnand %p1646_p9, %p1640_p6 }
 0xbd4   :  { %v1129_v16 = vpop.f32.mrb[12].mxu0 }
 0xbd5   :  { %v1130_v51 = vadd.f32 %v1207_v37, %v1129_v16  ;;  %v1436_v52 = vpop.f32.mrb[13].mxu0 }
 0xbd6   :  { %v1132_v53 = vpop.f32.mrb[14].mxu0 }
 0xbd7   :  { %v1137_v54 = vadd.f32 %v1130_v51, %v1834_v17  ;;  %v1437_v55 = vpop.f32.mrb[15].mxu0 }
 0xbd9   :  { %1139 = vst [vmem:[#allocation11 + $0x8] sm:$0xff] %v1137_v54 }
 0xbda   :  { %1650 = shalt.err (!%p1647_p10)
}
 0xbdb   :  { %s1651_s23 = scalar_lea.hbm %s2012_s9, 256 }
 0xbdc   :  { %p1652_p11 = scmp.ne.s32.totalorder %s2012_s9, %s1651_s23  ;;  %p1655_p12 = scmp.lt.u32.totalorder %s1651_s23, %s2012_s9 }
 0xbde   :  { %p1657_p13 = pnand %p1655_p12, %p1652_p11 }
 0xbe0   :  { %1660 = shalt.err (!%p1657_p13)
}
 0xbe1   :  { %1151 = dma.vmem_to_hbm [thread:$0]  %s1146_s17, 256, %s2012_s9, [#allocation4], %s1676_s5, %s1676_s5, %s1677_s28  }
 0xbe2   :  { %1667 = dma.done.wait [#allocation4], 256  }
 0xbe3   :  { %1668 = vsyncadd [#allocation4], 4294967040 }
 0xbe4   :  { %1669 = dma.done.wait [#allocation13], 256  }
 0xbe5   :  { %1670 = vsyncadd [#allocation13], 4294967040 }
 0xbe6   :  { %1170 = vsyncpa [#allocation3], 1 }
 0xbe7   :  { %1171 = vsyncpa [#allocation6], 1 }
 0xbe8   :  { %1172 = vsyncpa [#allocation9], 1 }
 0xbe9   :  { %1173 = vsyncpa [#allocation4], 1 }
 0xbea   :  { %1174 = vsyncpa [#allocation13], 1 }

</bundles_post_ra>
